<compile_context>
chip_gen: v7x
topology: tpu7x:2x2x1
jax: 0.10.0
libtpu: 0.0.40
codegen_flags: <defaults>
</compile_context>

<pallas_src>
from functools import partial

import jax
import jax.numpy as jnp
from jax.experimental import pallas as pl
from jax.experimental.pallas import tpu as pltpu

P_DROP = 0.5  # F.dropout default drop probability


def _round_up(n, m):
    return -(-n // m) * m


def _plan_tiles(n_rows, d, *, n_streams=1, vmem_budget=24 << 20):
    """Row-tile size, grid length and padded row count.

    VMEM accounting per pipeline stage (all double-buffered by BlockSpec):
      * each streamed (TN, D) f32 input block : TN * D * 4 bytes
      * the (TN, 1) f32 output block is lane-padded to 128 lanes: TN * 512 B
    The (1, D) weight + SMEM scalars are negligible.  24 MiB keeps the working
    set comfortably inside every generation once vmem_limit_bytes is raised;
    bump toward ~40 MiB on v7x for a few extra percent if desired.
    """
    n8 = _round_up(max(int(n_rows), 1), 8)
    per_row = n_streams * 2 * d * 4 + 2 * 128 * 4
    tn_max = max(8, (vmem_budget // per_row) // 8 * 8)
    grid = max(1, pl.cdiv(n8, tn_max))
    # Give the second v7x TensorCore work when there are enough rows
    # (harmless on single-core v5e/v6e: one extra ~0.35us grid step).
    if grid == 1 and n8 >= 16:
        grid = 2
    tn = _round_up(pl.cdiv(n8, grid), 8)
    return tn, grid, tn * grid


def _linear_rowsum(x, w_ref, b_ref, o_ref, scale):
    """(TN, D) -> (TN, 1): y = x @ (scale * w).T + b.

    D->1 GEMV: VPU multiply + XLU lane reduce (MXU would be <1% utilized).
    The dropout survivor scale is folded into the (1, D) weight once per tile.
    """
    w = w_ref[...] if scale == 1.0 else w_ref[...] * jnp.float32(scale)
    y = jnp.sum(x * w, axis=-1, keepdims=True) + b_ref[0]
    o_ref[...] = y.astype(o_ref.dtype)


def _dlr_eval_kernel(b_ref, x_ref, w_ref, o_ref):
    """Eval mode: dropout is the identity, plain y = x @ w.T + b."""
    _linear_rowsum(x_ref[...], w_ref, b_ref, o_ref, 1.0)


def _dlr_train_kernel(seed_ref, b_ref, x_ref, w_ref, o_ref, *,
                      keep_threshold, inv_keep):
    """Training mode, on-chip PRNG dropout mask (zero HBM mask traffic).

    seed_ref: (1,)    i32 SMEM
    b_ref:    (1,)    f32 SMEM
    x_ref:    (TN, D) f32 VMEM
    w_ref:    (1, D)  f32 VMEM (resident)
    o_ref:    (TN, 1) f32 VMEM
    """
    # Re-seed per grid step -> every row tile gets an independent stream and
    # steps stay independent under megacore "parallel" scheduling.
    pltpu.prng_seed(seed_ref[0], pl.program_id(0))
    bits = pltpu.prng_random_bits(x_ref.shape)
    if bits.dtype != jnp.uint32:
        bits = pltpu.bitcast(bits, jnp.uint32)
    keep = bits < jnp.uint32(keep_threshold)            # P(keep) = 1 - p
    _linear_rowsum(jnp.where(keep, x_ref[...], 0.0), w_ref, b_ref, o_ref, inv_keep)


def _dlr_train_kernel_hostbits(b_ref, x_ref, bits_ref, w_ref, o_ref, *,
                               keep_threshold, inv_keep):
    """Testing/interpret fallback: mask bits streamed from HBM (u32).

    Only used when the default backend is not TPU (pltpu.prng_random_bits has
    no CPU/interpret lowering); ~3x the training HBM traffic of the on-chip
    path, so never selected on real hardware.
    """
    keep = bits_ref[...] < jnp.uint32(keep_threshold)
    _linear_rowsum(jnp.where(keep, x_ref[...], 0.0), w_ref, b_ref, o_ref, inv_keep)


def dropout_linear_regression_forward(x, w, b, key, *, training=True,
                                      p=P_DROP, use_onchip_prng=None):
    """x: (N, D) f32, w: (1, D) f32, b: (1,) f32, key: PRNG key -> (N, 1) f32."""
    N, D = x.shape
    if use_onchip_prng is None:
        use_onchip_prng = jax.default_backend() == "tpu"

    if training and p >= 1.0:
        # Degenerate: every feature dropped -> output is just the bias.
        return jnp.broadcast_to(b.reshape(1, 1).astype(jnp.float32), (N, 1))

    is_dropout = training and p > 0.0
    n_streams = 2 if (is_dropout and not use_onchip_prng) else 1
    tn, grid_n, n_pad = _plan_tiles(N, D, n_streams=n_streams)
    x_p = x if n_pad == N else jnp.pad(x, ((0, n_pad - N), (0, 0)))

    smem_spec = pl.BlockSpec(memory_space=pltpu.MemorySpace.SMEM)   # scalars
    row_spec = pl.BlockSpec((tn, D), lambda i: (i, 0))              # streamed rows
    w_spec = pl.BlockSpec((1, D), lambda i: (0, 0))                 # resident weight
    out_spec = pl.BlockSpec((tn, 1), lambda i: (i, 0))

    cparams = pltpu.CompilerParams(
        dimension_semantics=("parallel",),     # shard row tiles across v7x TCs
        vmem_limit_bytes=48 << 20,             # > default scope on v5e/v6e, < v7x physical
    )
    grid = (grid_n,)
    out_shape = jax.ShapeDtypeStruct((n_pad, 1), jnp.float32)
    bias = b.astype(jnp.float32)

    if not is_dropout:
        # Eval mode (or p == 0): dropout is exactly the identity.
        cost = pl.CostEstimate(flops=2 * n_pad * D, transcendentals=0,
                               bytes_accessed=(n_pad * D + n_pad + D) * 4)
        y = pl.pallas_call(
            _dlr_eval_kernel, out_shape=out_shape, grid=grid,
            in_specs=[smem_spec, row_spec, w_spec], out_specs=out_spec,
            compiler_params=cparams, cost_estimate=cost,
        )(bias, x_p, w)
        return y[:N]

    keep_prob = 1.0 - float(p)
    keep_threshold = min(int(round(keep_prob * (2 ** 32))), 2 ** 32 - 1)
    inv_keep = 1.0 / keep_prob

    if use_onchip_prng:
        seed = jax.random.randint(key, (1,), 0, jnp.iinfo(jnp.int32).max,
                                  dtype=jnp.int32)
        kernel = partial(_dlr_train_kernel,
                         keep_threshold=keep_threshold, inv_keep=inv_keep)
        cost = pl.CostEstimate(flops=4 * n_pad * D, transcendentals=0,
                               bytes_accessed=(n_pad * D + n_pad + D) * 4)
        y = pl.pallas_call(
            kernel, out_shape=out_shape, grid=grid,
            in_specs=[smem_spec, smem_spec, row_spec, w_spec],
            out_specs=out_spec, compiler_params=cparams, cost_estimate=cost,
        )(seed, bias, x_p, w)
    else:
        # TODO(synk): testing-only path; mask traffic could shrink 4x with u8
        # bits, but the compiled TPU path above never streams a mask at all.
        bits = jax.random.bits(key, (n_pad, D), dtype=jnp.uint32)
        kernel = partial(_dlr_train_kernel_hostbits,
                         keep_threshold=keep_threshold, inv_keep=inv_keep)
        cost = pl.CostEstimate(flops=4 * n_pad * D, transcendentals=0,
                               bytes_accessed=(2 * n_pad * D + n_pad + D) * 4)
        y = pl.pallas_call(
            kernel, out_shape=out_shape, grid=grid,
            in_specs=[smem_spec, row_spec, row_spec, w_spec],
            out_specs=out_spec, compiler_params=cparams, cost_estimate=cost,
        )(bias, x_p, bits, w)

    return y[:N]


if __name__ == "__main__":
    # Small, module-consistent shapes: batch N=32, dim D=128 (grid of 2 tiles).
    N, D = 32, 128

    key = jax.random.PRNGKey(0)
    kx, kw, kb, kdrop = jax.random.split(key, 4)

    x = jax.random.normal(kx, (N, D), dtype=jnp.float32)
    # Deterministic parameter init matching nn.Linear(dim, 1) shapes.
    bound = 1.0 / float(D) ** 0.5
    w = jax.random.uniform(kw, (1, D), dtype=jnp.float32, minval=-bound, maxval=bound)
    b = jax.random.uniform(kb, (1,), dtype=jnp.float32, minval=-bound, maxval=bound)

    # --- eval mode: dropout is identity -> exact check vs plain JAX ---
    y_eval = jax.block_until_ready(
        dropout_linear_regression_forward(x, w, b, kdrop, training=False))
    y_ref = x @ w.T + b[0]
    assert y_eval.shape == (N, 1)
    assert jnp.allclose(y_eval, y_ref, atol=1e-5, rtol=1e-5)

    # --- training with p=0: must exactly match eval (identity dropout) ---
    y_p0 = jax.block_until_ready(
        dropout_linear_regression_forward(x, w, b, kdrop, training=True, p=0.0))
    assert jnp.array_equal(y_p0, y_eval)

    # --- training mode, p=0.5, on-chip PRNG mask ---
    y_tr1 = jax.block_until_ready(
        dropout_linear_regression_forward(x, w, b, kdrop, training=True))
    y_tr2 = jax.block_until_ready(
        dropout_linear_regression_forward(x, w, b, kdrop, training=True))
    assert y_tr1.shape == (N, 1)
    assert bool(jnp.all(jnp.isfinite(y_tr1)))
    assert jnp.allclose(y_tr1, y_tr2)          # deterministic for a fixed key

    # Structural check of inverted-dropout semantics: with x == 1, w == 1/D,
    # b == 0, each output row equals (2/D) * (#kept features in that row), so
    # y * D / 2 must be integral and the mean keep-rate over N*D Bernoulli(0.5)
    # draws must be ~0.5 (0.45..0.55 is > 6 sigma of slack).
    ones = jnp.ones((N, D), jnp.float32)
    w1 = jnp.full((1, D), 1.0 / D, jnp.float32)
    b0 = jnp.zeros((1,), jnp.float32)
    y_cnt = jax.block_until_ready(
        dropout_linear_regression_forward(ones, w1, b0, kdrop, training=True))
    kept = y_cnt[:, 0] * D / 2.0
    assert bool(jnp.all(jnp.abs(kept - jnp.round(kept)) < 1e-3))
    keep_rate = float(jnp.mean(kept)) / D
    assert 0.45 < keep_rate < 0.55, keep_rate

    print("KERNEL_OK")
</pallas_src>

<mosaic_0001>
module attributes {stable_mosaic.version = 11 : i64} {
  func.func @_dlr_eval_kernel(%arg0: i32, %arg1: memref<1xf32, #tpu.memory_space<smem>>, %arg2: memref<16x128xf32, #tpu.memory_space<vmem>>, %arg3: memref<1x128xf32, #tpu.memory_space<vmem>>, %arg4: memref<16x1xf32, #tpu.memory_space<vmem>>) attributes {dimension_semantics = [#tpu.dimension_semantics<parallel>], iteration_bounds = array<i64: 2>, scalar_prefetch = 0 : i64, scratch_operands = 0 : i64, tpu.core_type = #tpu.core_type<tc>, window_params = [{transform_indices = @transform_0, window_bounds = array<i64: 1>}, {transform_indices = @transform_1, window_bounds = array<i64: 16, 128>}, {pipeline_mode = #tpu.pipeline_mode<synchronous>, transform_indices = @transform_2, window_bounds = array<i64: 1, 128>}, {transform_indices = @transform_3, window_bounds = array<i64: 16, 1>}]} {
    %c0 = arith.constant 0 : index
    %c0_0 = arith.constant 0 : index
    %0 = vector.load %arg2[%c0, %c0_0] : memref<16x128xf32, #tpu.memory_space<vmem>>, vector<16x128xf32>
    %c0_1 = arith.constant 0 : index
    %c0_2 = arith.constant 0 : index
    %1 = vector.load %arg3[%c0_1, %c0_2] : memref<1x128xf32, #tpu.memory_space<vmem>>, vector<1x128xf32>
    %2 = vector.broadcast %1 : vector<1x128xf32> to vector<16x128xf32>
    %3 = arith.mulf %0, %2 : vector<16x128xf32>
    %cst = arith.constant dense<0.000000e+00> : vector<16xf32>
    %4 = vector.multi_reduction <add>, %3, %cst [1] : vector<16x128xf32> to vector<16xf32>
    %5 = vector.shape_cast %4 : vector<16xf32> to vector<16x1xf32>
    %c0_3 = arith.constant 0 : index
    %6 = memref.load %arg1[%c0_3] : memref<1xf32, #tpu.memory_space<smem>>
    %7 = vector.broadcast %6 : f32 to vector<16x1xf32>
    %8 = arith.addf %5, %7 : vector<16x1xf32>
    %c0_4 = arith.constant 0 : index
    %c0_5 = arith.constant 0 : index
    %9 = vector.load %arg4[%c0_4, %c0_5] : memref<16x1xf32, #tpu.memory_space<vmem>>, vector<16x1xf32>
    tpu.vector_store %arg4[%c0_4, %c0_5], %8 {strides = array<i32>} : memref<16x1xf32, #tpu.memory_space<vmem>>, vector<16x1xf32>,
    return
  }
  func.func @transform_0(%arg0: i32) -> i32 {
    %c0_i32 = arith.constant 0 : i32
    %c0_i32_0 = arith.constant 0 : i32
    return %c0_i32 : i32
  }
  func.func @transform_1(%arg0: i32) -> (i32, i32) {
    %c0_i32 = arith.constant 0 : i32
    %c0_i32_0 = arith.constant 0 : i32
    return %arg0, %c0_i32 : i32, i32
  }
  func.func @transform_2(%arg0: i32) -> (i32, i32) {
    %c0_i32 = arith.constant 0 : i32
    %c0_i32_0 = arith.constant 0 : i32
    %c0_i32_1 = arith.constant 0 : i32
    return %c0_i32, %c0_i32_0 : i32, i32
  }
  func.func @transform_3(%arg0: i32) -> (i32, i32) {
    %c0_i32 = arith.constant 0 : i32
    %c0_i32_0 = arith.constant 0 : i32
    return %arg0, %c0_i32 : i32, i32
  }
}

</mosaic_0001>

<bundles_post_ra>
// kernel: tpu_custom_call.1
= control target key start
LH: loop header
LB: loop body
LE: loop exit
PB: predicated region body
PF: predicated region fallthrough
CT: control target
= control target key end

     0   :  { %s541_s0 = inlined_call_operand.<no memory space> [shape: f32[1], index: 0, kind: input, shape index: {}]   ;;  %s542_s1 = inlined_call_operand.hbm [shape: f32[32,128], index: 1, kind: input, shape index: {}]   ;;  %s543_s2 = inlined_call_operand.vmem [shape: f32[1,128], index: 2, kind: input, shape index: {}]   ;;  %s544_s3 = inlined_call_operand.vmem [shape: f32[32,1], index: 3, kind: output, shape index: {}]  }
   0x1   :  { %8 = sst [smem:[#allocation2]] %s541_s0 }
   0x2   :  { %9 = vsyncpa [#allocation4], 0 }
   0x3   :  { %11 = vsyncpa [#allocation4 + $0x1], 0  ;;  %s431_s14 = smov 0   ;;  %s433_s15 = smov 0  }
   0x4   :  { %s435_s16 = smov 0   ;;  %s437_s17 = smov 0  }
   0x5 LB: > { %s283_s0 = sadd.s32 4294967295, %s403_s17   ;;  %s451_s18 = sadd.s32 1, %s403_s17   ;;  %s403_s17 = sphi %s437_s17, %s551_s17   ;;  %s399_s16 = sphi %s435_s16, %s550_s16   ;;  %s395_s15 = sphi %s433_s15, %s549_s15   ;;  %s391_s14 = sphi %s431_s14, %s548_s14  }
   0x6   : > { %s42_s19 = ssub.s32 %s403_s17, %s451_s18  ;;  %s45_s20 = sadd.s32 1, %s399_s16 }
   0x7   : > { %p43_p0 = scmp.eq.s32.totalorder %s42_s19, 0  ;;  %p52_p1 = scmp.ne.s32.totalorder %s399_s16, %s395_s15 }
   0x8   : > { %p53_p2 = scmp.eq.s32.totalorder %s403_s17, 0  ;;  %p58_p3 = scmp.ne.s32.totalorder %s395_s15, %s391_s14 }
   0x9   : > { %s461_s21 = scalar_select %p43_p0, %s399_s16, %s45_s20  }
   0xa   : > { %p54_p4 = por %p53_p2, %p52_p1  ;;  %p59_p5 = scmp.eq.s32.totalorder %s283_s0, 0 }
   0xb   : > { %p304_p6 = scmp.lt.s32.totalorder %s403_s17, 2  ;;  %s135_s23 = sand.u32 1, %s399_s16  }
   0xc   : > { %p466_p7 = por %p59_p5, %p58_p3  ;;  %s287_s24 = sshll.u32 %s135_s23, 4 }
   0xd   : > { %s297_s25 = sshll.u32 %s403_s17, 8  ;;  %s139_s29 = scalar_lea.vmem [#allocation3], %s287_s24 }
   0xe   : > { %s475_s28 = scalar_lea.hbm %s542_s1, %s297_s25  ;;  %s146_s30 = sshll.u32 %s139_s29, 4  ;;  %s477_s30 = int_to_ptr.vmem [resolvable:$true] %s146_s30 }
   0xf   : > { %p479_p8 = pnand %p304_p6, %p54_p4  ;;  %s484_s5 = scalar_lea.sflag [#allocation4], %s135_s23 }
  0x10   : > { %s339_s6 = scalar_lea.hbm %s475_s28, 256  ;;  %s344_s9 = scalar_lea.hbm %s542_s1, 512 }
  0x11   : > { %p340_p10 = scmp.ne.s32.totalorder %s475_s28, %s339_s6  ;;  %p341_p11 = pneg %p479_p8 }
  0x12   : > { %p345_p0 = scmp.lt.u32.totalorder %s475_s28, %s542_s1  ;;  %p346_p1 = scmp.lt.u32.totalorder %s344_s9, %s339_s6 }
  0x13   : > { %p342_p12 = pnand %p341_p11, %p340_p10  ;;  %p348_p3 = scmp.lt.u32.totalorder %s339_s6, %s475_s28 }
  0x14   : > { %p347_p2 = por %p346_p1, %p345_p0 }
  0x15   : > { %p343_p13 = pneg %p342_p12 }
  0x16   : > { %p349_p4 = por %p348_p3, %p347_p2 }
  0x18   : > { %p350_p5 = pnand %p349_p4, %p343_p13 }
  0x1a   : > { %353 = shalt.err (!%p350_p5)
}
  0x1b   : > { %s354_s12 = scalar_lea.vmem %s477_s30, 256  ;;  %s405_s13 = smov [#allocation3]  }
  0x1c   : > { %p355_p6 = scmp.ne.s32.totalorder %s477_s30, %s354_s12  ;;  %s359_s14 = sshll.u32 %s405_s13, 4  ;;  %s360_s14 = int_to_ptr.vmem [resolvable:$false] %s359_s14 }
  0x1d   : > { %s361_s19 = scalar_lea.vmem %s360_s14, 512  ;;  %p362_p9 = scmp.lt.s32.totalorder %s477_s30, %s360_s14 }
  0x1e   : > { %p357_p10 = pnand %p355_p6, %p341_p11  ;;  %p363_p0 = scmp.lt.s32.totalorder %s361_s19, %s354_s12 }
  0x20   : > { %p358_p12 = pneg %p357_p10  ;;  %p364_p1 = por %p363_p0, %p362_p9 }
  0x22   : > { %p365_p2 = pnand %p364_p1, %p358_p12 }
  0x24   : > { %368 = shalt.err (!%p365_p2)
}
  0x25   : > { %s406_s20 = smov 128   ;;  %s407_s23 = smov 8  }
  0x26   : > { %303 = dma.hbm_to_vmem [thread:$0]  (!%p479_p8), %s475_s28, 256, %s477_s30, %s484_s5, %s406_s20, %s406_s20, %s407_s23  }
  0x27   : > { %p154_p11 = scmp.lt.s32.totalorder %s403_s17, 3  ;;  %p547_p13 = scmp.ge.s32.totalorder %s403_s17, 1 }
  0x29   : > { %p155_p3 = pnand %p547_p13, %p154_p11 }
  0x2a   : > { %s160_s24 = sand.u32 (!%p155_p3), 1, %s395_s15  }
  0x2b   : > { %158 = sbr.rel (%p155_p3) target bundleno = 204 (0xcc), region = 32  ;;  %s291_s25 = sshll.u32 (!%p155_p3), %s160_s24, 4 }
  0x2c   : > { %s161_s26 = scalar_lea.sflag (!%p155_p3), [#allocation4], %s160_s24  ;;  %s164_s27 = scalar_lea.vmem (!%p155_p3), [#allocation3], %s291_s25 }
  0x32   : > { %386 = dma.done.wait (%p466_p7), %s161_s26, 256  }
  0x33   : > { %388 = vsyncadd (%p466_p7), %s161_s26, 4294967040  ;;  %v194_v0 = vld [vmem:[%s164_s27] sm:$0xff]  ;;  %v195_v2 = vld [vmem:[%s164_s27 + $0x8] sm:$0xff]  ;;  %s292_s28 = sshll.u32 %s283_s0, 1  ;;  %s209_s30 = sld [smem:[#allocation2]]  ;;  %vm213_vm0 = vcmask 7168  }
  0x34   : > { %v294_v1 = vld [vmem:[%s543_s2] ss:$0 sm:$0xff]  ;;  %p189_p8 = scmp.lt.s32.totalorder %s292_s28, 3 }
  0x35   : > { %v203_v3 = vmul.f32 %v294_v1, %v194_v0  ;;  %v204_v4 = vmul.f32 %v294_v1, %v195_v2 }
  0x36   : > { %s553_s28 = smov (!%p189_p8, %s292_s28), 3 }
  0x37   : > { %205 = vadd.xlane.f32.xlu0 %v203_v3  ;;  %s293_s5 = sshll.u32 %s553_s28, 3 }
  0x38   : > { %s192_s7 = scalar_lea.vmem %s544_s3, %s293_s5 }
  0x39   : > { %v210_v5 = vstv %s209_s30 }
  0x3b   : > { %207 = vadd.xlane.f32.xlu0 %v204_v4 }
  0xc4   : > { %v206_v6 = vpop.xlane.xlu0 %205 }
  0xc5   : > { %v211_v7 = vadd.f32 %v210_v5, %v206_v6 }
  0xc7   : > { %214 = vst.msk [vmem:[%s192_s7] sm:$0xff] %vm213_vm0, %v211_v7 }
  0xc8   : > { %v208_v8 = vpop.xlane.xlu0 %207 }
  0xc9   : > { %v212_v9 = vadd.f32 %v210_v5, %v208_v8 }
  0xcb   : > { %215 = vst.msk [vmem:[%s192_s7 + $0x8] sm:$0xff] %vm213_vm0, %v212_v9 }
  0xcc PF: > { %p14_p7 = scmp.ge.s32.totalorder %s451_s18, 4   ;;  %s548_s14 = smov %s395_s15 }
  0xcd   : > { %s549_s15 = smov %s399_s16  ;;  %s550_s16 = smov %s461_s21 }
  0xce   : > { %s551_s17 = smov %s451_s18  ;;  %16 = sbr.rel (!%p14_p7) target bundleno = 5 (0x5), region = 72 }
  0xd5   :  { %238 = vsyncpa [#allocation4], 1 }
  0xd6   :  { %240 = vsyncpa [#allocation4 + $0x1], 1 }

</bundles_post_ra>
